<compile_context>
chip_gen: v5e
topology: v5e:2x2
jax: 0.10.0
libtpu: 0.0.40
codegen_flags: <defaults>
</compile_context>

<pallas_src>
import functools

import jax
import jax.numpy as jnp
from jax.experimental import pallas as pl
from jax.experimental.pallas import tpu as pltpu


def _sublane_pack(itemsize):
    # Rows per packed (sublane) tile: 8 for 32-bit, 16 for bf16, 32 for int8.
    return {4: 8, 2: 16, 1: 32}.get(itemsize, 8)


def _round_up(x, m):
    return (x + m - 1) // m * m


def _vmem_capacity_bytes():
    """Physical VMEM of the current TPU generation (fallback: v7x-sized)."""
    try:
        return int(pltpu.get_tpu_info().vmem_capacity_bytes)
    except Exception:
        return 64 * 1024 * 1024


def _pick_spatial_tile(hw, c1, ctot, itemsize, vmem_budget, batch, max_tile=8192):
    """Spatial (lane) tile: a multiple of 128 as large as the VMEM budget
    allows (capped at max_tile lanes), cdiv-tiled over hw."""
    if hw <= 128:
        # Full-extent last dim is always a legal block; nothing to tile.
        return hw
    sub = _sublane_pack(itemsize)
    # Double-buffered input tile (C1 rows) + output tile (Ctot rows) per
    # spatial column, with channels rounded up to the sublane pack.
    per_col = 2 * (_round_up(c1, sub) + _round_up(ctot, sub)) * itemsize
    cap = max(128, min(max_tile, vmem_budget // per_col))
    cap = (cap // 128) * 128
    if batch == 1:
        # v7x megacore: keep >=2 spatial blocks so both TensorCores get work.
        cap = min(cap, max(128, (hw // 2) // 128 * 128))
    cap = min(cap, (hw // 128) * 128)          # never exceed the array extent
    # Prefer an exact divisor of hw (no masked tail block); else cdiv + tail.
    t = cap
    while t >= 128:
        if hw % t == 0:
            return t
        t -= 128
    return cap


def _fusion_kernel(ip_ref, emb_ref, out_ref, *, c1, c2, ts):
    # Channels [0, C1): feature-map pass-through (lane-dense tile copy).
    out_ref[:, :c1, :] = ip_ref[...]
    # Channels [C1, C1+C2): per-batch embedding column, lane-broadcast over the
    # spatial tile (== torch stack + stack + repeat, then cat).  The (1, C2, 1)
    # emb block has a batch-only index map, so it stays VMEM-resident across
    # all spatial steps of a batch; the broadcast is a handful of vregs that
    # hides under the HBM tile DMAs.
    col = emb_ref[0]                                      # (C2, 1)
    out_ref[:, c1:, :] = jnp.broadcast_to(col, (c2, ts))[None]


def fusion_layer(ip, emb):
    """Pallas implementation of FusionLayer.forward((ip, emb))."""
    B, C1, H, W = ip.shape
    B2, C2 = emb.shape
    assert B == B2, "batch dims of ip and emb must match"
    emb = emb.astype(ip.dtype)

    HW = H * W
    Ctot = C1 + C2
    itemsize = jnp.dtype(ip.dtype).itemsize
    sub = _sublane_pack(itemsize)

    # Generation-aware VMEM budget (~62.5% of physical: ~40 MiB on v7x,
    # ~80 MiB on v5e/v6e) for the double-buffered tile working set.
    vmem_cap = _vmem_capacity_bytes()
    vmem_budget = vmem_cap * 5 // 8

    TS = _pick_spatial_tile(HW, C1, Ctot, itemsize, vmem_budget, B)
    n_s = pl.cdiv(HW, TS)

    # Lane-dense layout: free reshape (HBM is contiguous over H, W).
    ip_flat = ip.reshape(B, C1, HW)
    emb_col = emb[:, :, None]                 # (B, C2, 1): C2 on sublanes

    # Double-buffered ip/out tiles + double-buffered tiny per-batch emb block,
    # with channel rows rounded up to the sublane pack and lanes to 128.
    ts_pad = _round_up(TS, 128)
    needed = (2 * (_round_up(C1, sub) + _round_up(Ctot, sub)) * ts_pad * itemsize
              + 2 * _round_up(C2, sub) * 128 * itemsize)
    vmem_limit = int(min(vmem_cap * 9 // 10, max(2 * needed, 32 * 1024 * 1024)))

    kernel = functools.partial(_fusion_kernel, c1=C1, c2=C2, ts=TS)

    out_flat = pl.pallas_call(
        kernel,
        out_shape=jax.ShapeDtypeStruct((B, Ctot, HW), ip.dtype),
        grid_spec=pltpu.PrefetchScalarGridSpec(
            num_scalar_prefetch=0,
            grid=(B, n_s),
            in_specs=[
                pl.BlockSpec((1, C1, TS), lambda b, s: (b, 0, s)),
                pl.BlockSpec((1, C2, 1), lambda b, s: (b, 0, 0)),
            ],
            out_specs=pl.BlockSpec((1, Ctot, TS), lambda b, s: (b, 0, s)),
        ),
        compiler_params=pltpu.CompilerParams(
            dimension_semantics=("parallel", "parallel"),
            vmem_limit_bytes=vmem_limit,
        ),
    )(ip_flat, emb_col)

    return out_flat.reshape(B, Ctot, H, W)


def fusion_layer_ref(ip, emb):
    """Pure-JAX reference for correctness checking."""
    B, C1, H, W = ip.shape
    C2 = emb.shape[1]
    emb_b = jnp.broadcast_to(emb[:, :, None, None].astype(ip.dtype), (B, C2, H, W))
    return jnp.concatenate([ip, emb_b], axis=1)


if __name__ == "__main__":
    # FusionLayer has no learnable parameters; only deterministic inputs.
    key = jax.random.PRNGKey(0)
    k_ip, k_emb = jax.random.split(key)

    B, C1, C2, H, W = 2, 4, 4, 16, 16
    ip = jax.random.normal(k_ip, (B, C1, H, W), dtype=jnp.float32)
    emb = jax.random.normal(k_emb, (B, C2), dtype=jnp.float32)

    out = jax.block_until_ready(fusion_layer(ip, emb))
    ref = fusion_layer_ref(ip, emb)

    assert out.shape == (B, C1 + C2, H, W), out.shape
    assert jnp.allclose(out, ref), "Pallas output mismatch vs reference"

    print("KERNEL_OK")
</pallas_src>

<mosaic_0001>
module attributes {stable_mosaic.version = 11 : i64} {
  func.func @_fusion_kernel(%arg0: i32, %arg1: i32, %arg2: memref<1x4x256xf32, #tpu.memory_space<vmem>>, %arg3: memref<1x4x1xf32, #tpu.memory_space<vmem>>, %arg4: memref<1x8x256xf32, #tpu.memory_space<vmem>>) attributes {dimension_semantics = [#tpu.dimension_semantics<parallel>, #tpu.dimension_semantics<parallel>], iteration_bounds = array<i64: 2, 1>, scalar_prefetch = 0 : i64, scratch_operands = 0 : i64, tpu.core_type = #tpu.core_type<tc>, window_params = [{transform_indices = @transform_0, window_bounds = array<i64: 1, 4, 256>}, {transform_indices = @transform_1, window_bounds = array<i64: 1, 4, 1>}, {transform_indices = @transform_2, window_bounds = array<i64: 1, 8, 256>}]} {
    %c0 = arith.constant 0 : index
    %c0_0 = arith.constant 0 : index
    %c0_1 = arith.constant 0 : index
    %0 = vector.load %arg2[%c0, %c0_0, %c0_1] : memref<1x4x256xf32, #tpu.memory_space<vmem>>, vector<1x4x256xf32>
    %c0_2 = arith.constant 0 : index
    %c0_3 = arith.constant 0 : index
    %c0_4 = arith.constant 0 : index
    %1 = vector.load %arg4[%c0_2, %c0_3, %c0_4] : memref<1x8x256xf32, #tpu.memory_space<vmem>>, vector<1x4x256xf32>
    tpu.vector_store %arg4[%c0_2, %c0_3, %c0_4], %0 {strides = array<i32>} : memref<1x8x256xf32, #tpu.memory_space<vmem>>, vector<1x4x256xf32>,
    %c0_5 = arith.constant 0 : index
    %c0_6 = arith.constant 0 : index
    %c0_7 = arith.constant 0 : index
    %2 = vector.load %arg3[%c0_5, %c0_6, %c0_7] : memref<1x4x1xf32, #tpu.memory_space<vmem>>, vector<1x4x1xf32>
    %3 = vector.shape_cast %2 : vector<1x4x1xf32> to vector<4x1xf32>
    %4 = vector.shape_cast %3 : vector<4x1xf32> to vector<4x1xf32>
    %5 = vector.broadcast %4 : vector<4x1xf32> to vector<4x256xf32>
    %6 = vector.shape_cast %5 : vector<4x256xf32> to vector<1x4x256xf32>
    %c0_8 = arith.constant 0 : index
    %c4 = arith.constant 4 : index
    %c0_9 = arith.constant 0 : index
    %7 = vector.load %arg4[%c0_8, %c4, %c0_9] : memref<1x8x256xf32, #tpu.memory_space<vmem>>, vector<1x4x256xf32>
    tpu.vector_store %arg4[%c0_8, %c4, %c0_9], %6 {strides = array<i32>} : memref<1x8x256xf32, #tpu.memory_space<vmem>>, vector<1x4x256xf32>,
    return
  }
  func.func @transform_0(%arg0: i32, %arg1: i32) -> (i32, i32, i32) {
    %c0_i32 = arith.constant 0 : i32
    %c0_i32_0 = arith.constant 0 : i32
    return %arg0, %c0_i32, %arg1 : i32, i32, i32
  }
  func.func @transform_1(%arg0: i32, %arg1: i32) -> (i32, i32, i32) {
    %c0_i32 = arith.constant 0 : i32
    %c0_i32_0 = arith.constant 0 : i32
    %c0_i32_1 = arith.constant 0 : i32
    return %arg0, %c0_i32, %c0_i32_0 : i32, i32, i32
  }
  func.func @transform_2(%arg0: i32, %arg1: i32) -> (i32, i32, i32) {
    %c0_i32 = arith.constant 0 : i32
    %c0_i32_0 = arith.constant 0 : i32
    return %arg0, %c0_i32, %arg1 : i32, i32, i32
  }
}

</mosaic_0001>

<bundles_post_ra>
// kernel: tpu_custom_call.1
= control target key start
LH: loop header
LB: loop body
LE: loop exit
PB: predicated region body
PF: predicated region fallthrough
CT: control target
= control target key end

     0   :  { %7 = vsyncpa [#allocation3], 0  ;;  %s670_s0 = inlined_call_operand.hbm [shape: f32[2,4,256], index: 0, kind: input, shape index: {}]   ;;  %s671_s1 = inlined_call_operand.vmem [shape: f32[2,4,1], index: 1, kind: input, shape index: {}]   ;;  %s672_s2 = inlined_call_operand.hbm [shape: f32[2,8,256], index: 2, kind: output, shape index: {}]  }
   0x1   :  { %9 = vsyncpa [#allocation3 + $0x1], 0 }
   0x2   :  { %10 = vsyncpa [#allocation4], 0 }
   0x3   :  { %12 = vsyncpa [#allocation4 + $0x1], 0  ;;  %s544_s9 = smov 0   ;;  %s546_s10 = smov 0  }
   0x4   :  { %s548_s11 = smov 0   ;;  %s550_s12 = smov 0  }
   0x5   :  { %s552_s13 = smov 0   ;;  %s554_s14 = smov 0  }
   0x6 LB: > { %s332_s15 = sadd.s32 4294967295, %s526_s14   ;;  %s333_s16 = sadd.s32 4294967294, %s526_s14   ;;  %s526_s14 = sphi %s554_s14, %s18_s14   ;;  %s522_s13 = sphi %s552_s13, %s681_s13   ;;  %s518_s12 = sphi %s550_s12, %s680_s12   ;;  %s514_s11 = sphi %s548_s11, %s679_s11   ;;  %s510_s10 = sphi %s546_s10, %s678_s10   ;;  %s506_s9 = sphi %s544_s9, %s677_s9  }
   0x7   : > { %s30_s17 = sadd.s32 1, %s522_s13  ;;  %s39_s18 = sadd.s32 1, %s514_s11 }
   0x8   : > { %p32_p0 = scmp.ge.s32.totalorder %s30_s17, 2  ;;  %p46_p1 = scmp.ne.s32.totalorder %s514_s11, %s510_s10 }
   0x9   : > { %p47_p2 = scmp.eq.s32.totalorder %s526_s14, 0  ;;  %p52_p3 = scmp.ne.s32.totalorder %s510_s10, %s506_s9 }
   0xa   : > { %s683_s17 = smov (%p32_p0, %s30_s17), 0  ;;  %p53_p5 = scmp.eq.s32.totalorder %s332_s15, 0 }
   0xb   : > { %p585_p4 = por %p47_p2, %p46_p1  ;;  %s34_s20 = ssub.s32 %s522_s13, %s683_s17 }
   0xc   : > { %p104_p6 = scmp.eq.s32.totalorder %s332_s15, 1  ;;  %p37_p7 = scmp.eq.s32.totalorder %s34_s20, 0 }
   0xd   : > { %p591_p8 = por %p53_p5, %p52_p3  ;;  %p110_p10 = scmp.eq.s32.totalorder %s333_s16, 1 }
   0xe   : > { %p595_p9 = por %p104_p6, %p46_p1  ;;  %p335_p12 = scmp.ge.s32.totalorder %s526_s14, 2 }
   0xf   : > { %s600_s23 = scalar_select %p37_p7, %s514_s11, %s39_s18  }
  0x10   : > { %p602_p11 = por %p110_p10, %p52_p3  ;;  %p362_p13 = scmp.lt.s32.totalorder %s526_s14, 2 }
  0x11   : > { %s130_s25 = sand.u32 1, %s514_s11   ;;  %s348_s27 = sshll.u32 %s522_s13, 3 }
  0x12   : > { %s336_s26 = sshll.u32 %s130_s25, 3  ;;  %s141_s30 = scalar_lea.hbm %s670_s0, %s348_s27 }
  0x13   : > { %s134_s3 = scalar_lea.vmem [#allocation2], %s336_s26  ;;  %s143_s5 = sshll.u32 %s141_s30, 4  ;;  %s144_s5 = int_to_ptr.hbm [resolvable:$true] %s143_s5 }
  0x14   : > { %s145_s4 = sshll.u32 %s134_s3, 4  ;;  %p355_p0 = pnand %p362_p13, %p585_p4  ;;  %s146_s4 = int_to_ptr.vmem [resolvable:$true] %s145_s4 }
  0x15   : > { %p339_p1 = scmp.ge.s32.totalorder %s526_s14, 1  ;;  %p157_p2 = scmp.lt.s32.totalorder %s526_s14, 3 }
  0x16   : > { %s131_s6 = scalar_lea.sflag [#allocation3], %s130_s25 }
  0x17   : > { %357 = dma.hbm_to_vmem [thread:$0]  (!%p355_p0), %s144_s5, 128, %s146_s4, %s131_s6  }
  0x18   : > { %p158_p3 = pnand %p339_p1, %p157_p2 }
  0x19   : > { %s618_s7 = sand.u32 (!%p158_p3), 1, %s510_s10  }
  0x1a   : > { %161 = sbr.rel (%p158_p3) target bundleno = 160 (0xa0), region = 28  ;;  %s340_s8 = sshll.u32 (!%p158_p3), %s618_s7, 3 }
  0x1b   : > { %s164_s15 = scalar_lea.sflag (!%p158_p3), [#allocation3], %s618_s7  ;;  %s167_s16 = scalar_lea.vmem (!%p158_p3), [#allocation2], %s340_s8 }
  0x1f   : > { %497 = dma.done.wait (%p591_p8), %s164_s15, 128  }
  0x20   : > { %499 = vsyncadd (%p591_p8), %s164_s15, 4294967168  ;;  %p194_p4 = scmp.lt.s32.totalorder %s518_s12, 1  ;;  %v528_v0 = vmov 0   ;;  %v199_v1 = vld [vmem:[%s167_s16] sm:$0xff]  ;;  %s341_s27 = sshll.u32 %s618_s7, 4 }
  0x21   : > { %413 = vset.pattern.permute.xlu0 %v528_v0  ;;  %201 = vst [vmem:[#allocation1] ss:$2 sm:$0xff] %v199_v1  ;;  %s192_s21 = scalar_lea.vmem [#allocation5], %s341_s27  ;;  %s349_s28 = sshll.u32 %s518_s12, 4 }
  0x22   : > { %s195_s18 = scalar_select %p194_p4, %s518_s12, 1 }
  0x23   : > { %s231_s3 = scalar_lea.hbm %s672_s2, %s349_s28  ;;  %s233_s4 = sshll.u32 %s192_s21, 4  ;;  %s234_s4 = int_to_ptr.vmem [resolvable:$true] %s233_s4 }
  0x24   : > { %s342_s19 = sshll.u32 %s195_s18, 2  ;;  %s235_s5 = sshll.u32 %s231_s3, 4  ;;  %s236_s5 = int_to_ptr.hbm [resolvable:$true] %s235_s5 }
  0x25   : > { %s197_s26 = scalar_lea.vmem %s671_s1, %s342_s19  ;;  %s218_s6 = scalar_lea.sflag [#allocation4], %s618_s7 }
  0x26   : > { %v208_v2 = vld [vmem:[%s197_s26] sm:$0xf]  ;;  %s458_s8 = sshra.s32 %s236_s5, 4  ;;  %s464_s18 = scalar_lea.hbm %s672_s2, 32  ;;  %s459_s8 = int_to_ptr.hbm [resolvable:$true] %s458_s8 }
  0x27   : > { %211 = vperm.xlu0 %413, %v208_v2   ;;  %s460_s15 = scalar_lea.hbm %s459_s8, 16  ;;  %p465_p8 = scmp.lt.s32.totalorder %s459_s8, %s672_s2 }
  0x28   : > { %v202_v3 = vld.sshfl [vmem:[#allocation1] sm:$0xff pattern:$0x75316420]  ;;  %v203_v4 = vld.sshfl [vmem:[#allocation1 + $0x8] sm:$0xff pattern:$0x75316420]  ;;  %p461_p5 = scmp.ne.s32.totalorder %s459_s8, %s460_s15  ;;  %p466_p10 = scmp.lt.s32.totalorder %s464_s18, %s460_s15 }
  0x29   : > { %206 = vst [vmem:[%s192_s21] sm:$0xf] %v202_v3 }
  0x2a   : > { %207 = vst [vmem:[%s192_s21 + $0x8] sm:$0xf] %v203_v4  ;;  %p462_p6 = pnand %p461_p5, %p595_p9  ;;  %p467_p13 = por %p466_p10, %p465_p8 }
  0x2c   : > { %p463_p7 = pneg %p462_p6 }
  0x2e   : > { %p468_p0 = pnand %p467_p13, %p463_p7 }
  0x99   : > { %v212_v5 = vpop.permute.xlu0 %211 }
  0x9a   : > { %v213_v6 = vrot.slane %v212_v5, 4 }
  0x9c   : > { %215 = vst [vmem:[%s192_s21] sm:$0xf0] %v213_v6 }
  0x9d   : > { %216 = vst [vmem:[%s192_s21 + $0x8] sm:$0xf0] %v213_v6 }
  0x9e   : > { %471 = shalt.err (!%p468_p0)
}
  0x9f   : > { %352 = dma.vmem_to_hbm [thread:$0]  (%p595_p9), %s234_s4, 256, %s236_s5, %s218_s6  }
  0xa0 PF: > { %s247_s7 = sand.u32 1, %s506_s9   ;;  %p359_p1 = pnand %p335_p12, %p602_p11 }
  0xa1   : > { %s248_s25 = scalar_lea.sflag [#allocation4], %s247_s7 }
  0xa2   : > { %p360_p2 = pneg %p359_p1 }
  0xa4   : > { %501 = dma.done.wait (%p360_p2), %s248_s25, 256  }
  0xa5   : > { %503 = vsyncadd (%p360_p2), %s248_s25, 4294967040  ;;  %s18_s14 = sadd.s32 1, %s526_s14   ;;  %s677_s9 = smov %s510_s10 }
  0xa6   : > { %p15_p3 = scmp.ge.s32.totalorder %s18_s14, 4   ;;  %s678_s10 = smov %s514_s11 }
  0xa7   : > { %s679_s11 = smov %s600_s23  ;;  %s680_s12 = smov %s522_s13 }
  0xa8   : > { %s681_s13 = smov %s683_s17  ;;  %17 = sbr.rel (!%p15_p3) target bundleno = 6 (0x6), region = 76 }
  0xad   :  { %254 = vsyncpa [#allocation3], 1 }
  0xae   :  { %256 = vsyncpa [#allocation3 + $0x1], 1 }
  0xaf   :  { %257 = vsyncpa [#allocation4], 1 }
  0xb0   :  { %259 = vsyncpa [#allocation4 + $0x1], 1 }

</bundles_post_ra>
